<compile_context>
chip_gen: v6e
topology: v6e:2x2x1
jax: 0.10.0
libtpu: 0.0.40
codegen_flags: <defaults>
</compile_context>

<pallas_src>
import jax
import jax.numpy as jnp
import numpy as np
from jax.experimental import pallas as pl
from jax.experimental.pallas import tpu as pltpu


# ---------------------------------------------------------------------------
# Hardware-aware budgets
# ---------------------------------------------------------------------------
def _hw_budgets():
    """Returns (physical VMEM estimate, scoped-VMEM limit, per-block byte cap)."""
    try:
        phys = int(pltpu.get_tpu_info().vmem_capacity_bytes)
    except Exception:
        phys = 64 * 1024 * 1024          # be conservative (v7x-sized) if unknown
    if phys >= 96 * 1024 * 1024:         # v5e / v6e: 128 MiB physical VMEM
        return phys, 64 * 1024 * 1024, 4 * 1024 * 1024
    # v7x: 64 MiB physical per TensorCore
    return phys, 32 * 1024 * 1024, 2 * 1024 * 1024


# ---------------------------------------------------------------------------
# Tile-size helpers (divisor-or-full-extent blocks only -> exact grids)
# ---------------------------------------------------------------------------
def _min_tile(dim, unit):
    """Smallest legal tile: smallest multiple of `unit` dividing dim, else full."""
    if dim % unit != 0:
        return dim
    t = unit
    while t < dim:
        if dim % t == 0:
            return t
        t += unit
    return dim


def _pick_tile(dim, unit, budget):
    """Largest legal tile (multiple of `unit` dividing dim, or full extent)
    that fits `budget` elements; falls back to the smallest legal tile."""
    cap = max(int(budget), 1)
    if dim <= cap:
        return dim                      # full extent is always legal
    if dim % unit != 0:
        return dim                      # only the full extent is legal
    t = (cap // unit) * unit
    while t >= unit:
        if dim % t == 0:
            return t
        t -= unit
    return _min_tile(dim, unit)


def _largest_divisor_leq(n, cap):
    """Largest divisor of n that is <= cap (at least 1)."""
    cap = max(min(int(cap), int(n)), 1)
    for d in range(cap, 0, -1):
        if n % d == 0:
            return d
    return 1


def _collapse_nonswapped(shape, lo, hi):
    """Collapse contiguous runs of non-swapped dims that are not among the last
    two (lane/sublane) dims.  Returns (new_shape, new_lo, new_hi)."""
    ndim = len(shape)
    keep = {lo, hi, ndim - 2, ndim - 1}
    groups = []
    d = 0
    while d < ndim:
        if d in keep:
            groups.append([d])
            d += 1
        else:
            run = [d]
            d += 1
            while d < ndim and d not in keep:
                run.append(d)
                d += 1
            groups.append(run)
    new_shape = tuple(int(np.prod([shape[i] for i in g])) for g in groups)
    first = {g[0]: gi for gi, g in enumerate(groups)}
    return new_shape, first[lo], first[hi]


# ---------------------------------------------------------------------------
# Kernels
# ---------------------------------------------------------------------------
def _copy_kernel(x_ref, o_ref):
    # Pure copy: the axis swap is done entirely by the output BlockSpec
    # index_map (DMA-side permutation); no in-kernel relayout.
    o_ref[...] = x_ref[...]


def _make_permute_kernel(perm):
    def kernel(x_ref, o_ref):
        # In-block relayout (needed when a swapped axis is one of the last two
        # lane/sublane dims); lowers to a compiler/XLU transpose.
        o_ref[...] = jnp.transpose(x_ref[...], perm)
    return kernel


def _make_out_index_map(perm):
    def out_map(*idxs):
        return tuple(idxs[p] for p in perm)
    return out_map


# ---------------------------------------------------------------------------
# Wrapper
# ---------------------------------------------------------------------------
def pallas_transpose(x, dim0, dim1):
    """torch.transpose(x, dim0, dim1) as a tiled, DMA-driven Pallas TPU kernel."""
    ndim = x.ndim
    dim0 %= ndim
    dim1 %= ndim
    if dim0 == dim1:
        return x                        # identity: no kernel, no HBM round trip

    lo0, hi0 = sorted((dim0, dim1))
    out_shape_full = tuple(
        x.shape[hi0] if d == lo0 else x.shape[lo0] if d == hi0 else x.shape[d]
        for d in range(ndim))

    # Pre-collapse contiguous non-swapped, non-minor dims (metadata-only reshape).
    cshape, lo, hi = _collapse_nonswapped(x.shape, lo0, hi0)
    cx = x.reshape(cshape) if cshape != x.shape else x
    cndim = len(cshape)

    perm = list(range(cndim))
    perm[lo], perm[hi] = perm[hi], perm[lo]
    perm = tuple(perm)
    c_out_shape = tuple(cshape[p] for p in perm)

    itemsize = cx.dtype.itemsize
    phys, vmem_limit, block_cap_bytes = _hw_budgets()
    cap_elems = max(block_cap_bytes // itemsize, 1)
    sub = {4: 8, 2: 16, 1: 32}.get(itemsize, 8)   # dtype-aware sublane unit

    H, W = cshape[-2], cshape[-1]
    block = [1] * cndim

    if hi <= cndim - 3:
        # Case I: neither swapped axis touches the last two dims -> pure copy,
        # swap lives entirely in the output index_map (DMA-side permutation).
        min_th, min_tw = _min_tile(H, sub), _min_tile(W, 128)
        tw = _pick_tile(W, 128, cap_elems // max(min_th, 1))
        th = _pick_tile(H, sub, cap_elems // max(tw, 1))
        if tw * th > cap_elems:
            th = min_th
        if tw * th > cap_elems:
            tw = min_tw
        block[-1], block[-2] = tw, th
    elif lo == cndim - 2:
        # Case II: sublane <-> lane swap; each tile length is a lane dim on one
        # side and a sublane dim on the other -> 128-unit (or full) on both.
        min_th, min_tw = _min_tile(H, 128), _min_tile(W, 128)
        tw = _pick_tile(W, 128, cap_elems // max(min_th, 1))
        th = _pick_tile(H, 128, cap_elems // max(tw, 1))
        if tw * th > cap_elems:
            th = min_th
        if tw * th > cap_elems:
            tw = min_tw
        block[-1], block[-2] = tw, th
    else:
        # Case III: one swapped axis is minor, the other leading (in-block relayout).
        L = cshape[lo]
        min_tw = _min_tile(W, 128)
        min_th = _min_tile(H, sub)
        if hi == cndim - 1:
            # leading <-> lane: tl becomes the OUTPUT lane dim -> budget it first
            # (unmasked lane-dense stores), then the input lane, then the sublane.
            min_tl = _min_tile(L, 128)
            tl = _pick_tile(L, 128, cap_elems // max(min_tw * min_th, 1))
            tw = _pick_tile(W, 128, cap_elems // max(tl * min_th, 1))
            th = _pick_tile(H, sub, cap_elems // max(tl * tw, 1))
        else:
            # leading <-> sublane: tw is the lane dim on both sides.
            min_tl = _min_tile(L, sub)
            tw = _pick_tile(W, 128, cap_elems // max(min_th * min_tl, 1))
            tl = _pick_tile(L, sub, cap_elems // max(tw * min_th, 1))
            th = _pick_tile(H, sub, cap_elems // max(tw * tl, 1))
        # Clamp if forced full extents overshot the per-block byte cap.
        if tw * th * tl > cap_elems:
            th = min_th
        if tw * th * tl > cap_elems:
            if hi == cndim - 1:
                tw = min_tw
            else:
                tl = min_tl
        if tw * th * tl > cap_elems:
            if hi == cndim - 1:
                tl = min_tl
            else:
                tw = min_tw
        block[-1], block[-2], block[lo] = tw, th, tl

    # Fold non-swapped leading dims into the block (innermost first) so each
    # grid step moves ~block-cap bytes, not just one trailing tile.
    rem = max(cap_elems // int(np.prod(block)), 1)
    for d in range(cndim - 3, -1, -1):
        if d in (lo, hi) or rem <= 1:
            continue
        b = _largest_divisor_leq(cshape[d], rem)
        block[d] = b
        rem //= b

    grid = [pl.cdiv(cshape[d], block[d]) for d in range(cndim)]
    # Keep >= 2 grid steps along a parallel axis (v7x megacore split).
    if int(np.prod(grid)) == 1:
        for d in range(cndim - 2):
            if d in (lo, hi):
                continue
            if cshape[d] >= 2:
                block[d] = _largest_divisor_leq(cshape[d], cshape[d] - 1)
                break
        grid = [pl.cdiv(cshape[d], block[d]) for d in range(cndim)]

    block = tuple(int(b) for b in block)
    grid = tuple(int(g) for g in grid)
    out_block = tuple(block[p] for p in perm)

    copy_only = block[lo] == 1 and block[hi] == 1
    kernel = _copy_kernel if copy_only else _make_permute_kernel(perm)

    in_map = lambda *idxs: idxs
    out_map = _make_out_index_map(perm)

    # 2 in + 2 out double-buffered blocks plus headroom; grow only if a
    # non-divisible shape forced an oversized full-extent block.
    blk_bytes = int(np.prod(block)) * itemsize
    vmem_limit = int(max(vmem_limit, min(4 * blk_bytes + (4 << 20), phys)))

    result = pl.pallas_call(
        kernel,
        out_shape=jax.ShapeDtypeStruct(c_out_shape, cx.dtype),
        grid_spec=pl.GridSpec(
            grid=grid,
            in_specs=[pl.BlockSpec(block, in_map)],
            out_specs=pl.BlockSpec(out_block, out_map),
        ),
        compiler_params=pltpu.CompilerParams(
            # Every grid step writes a disjoint output block -> fully parallel.
            dimension_semantics=("parallel",) * cndim,
            vmem_limit_bytes=vmem_limit,
        ),
        cost_estimate=pl.CostEstimate(
            flops=0, transcendentals=0, bytes_accessed=int(2 * cx.nbytes)),
    )(cx)

    return result.reshape(out_shape_full) if result.shape != out_shape_full else result


class Transpose:
    """JAX/Pallas counterpart of the PyTorch Transpose module."""

    def __init__(self, dim0, dim1):
        self.dim0, self.dim1 = dim0, dim1

    def __call__(self, x):
        return pallas_transpose(x, self.dim0, self.dim1)


if __name__ == "__main__":
    k0, k1, k2 = jax.random.split(jax.random.PRNGKey(0), 3)

    # Small NCHW-style input consistent with the classifier pipeline.
    x = jax.random.normal(k0, (2, 4, 16, 16), dtype=jnp.float32)

    # transpose(1, 2): leading <-> sublane swap (Case III, in-block relayout).
    y = jax.block_until_ready(Transpose(1, 2)(x))
    ref = jnp.swapaxes(x, 1, 2)
    assert y.shape == ref.shape and y.dtype == ref.dtype, (y.shape, ref.shape)
    np.testing.assert_array_equal(np.asarray(y), np.asarray(ref))

    # transpose(2, 3): lane <-> sublane (minor-dims) swap (Case II).
    y2 = jax.block_until_ready(Transpose(2, 3)(x))
    np.testing.assert_array_equal(np.asarray(y2), np.asarray(jnp.swapaxes(x, 2, 3)))

    # transpose(0, 2) on a 5-D tensor: neither swapped dim is minor (Case I) ->
    # pure-copy kernel; permutation done entirely by the BlockSpec index maps,
    # with the non-swapped leading dim folded into the block.
    x3 = jax.random.normal(k1, (2, 3, 4, 8, 128), dtype=jnp.float32)
    y3 = jax.block_until_ready(Transpose(0, 2)(x3))
    np.testing.assert_array_equal(np.asarray(y3), np.asarray(jnp.swapaxes(x3, 0, 2)))

    # bf16 leading <-> sublane swap: exercises the dtype-aware (16-row) sublane
    # tile unit in Case III.
    x4 = jax.random.normal(k2, (2, 16, 32, 128), dtype=jnp.bfloat16)
    y4 = jax.block_until_ready(Transpose(1, 2)(x4))
    np.testing.assert_array_equal(
        np.asarray(y4).astype(np.float32),
        np.asarray(jnp.swapaxes(x4, 1, 2)).astype(np.float32))

    # Identity transpose short-circuits without launching a kernel.
    assert Transpose(1, 1)(x) is x

    print("KERNEL_OK")
</pallas_src>

<mosaic_0001>
module attributes {stable_mosaic.version = 11 : i64} {
  func.func @kernel(%arg0: i32, %arg1: i32, %arg2: i32, %arg3: i32, %arg4: memref<1x4x16x16xf32, #tpu.memory_space<vmem>>, %arg5: memref<1x16x4x16xf32, #tpu.memory_space<vmem>>) attributes {dimension_semantics = [#tpu.dimension_semantics<parallel>, #tpu.dimension_semantics<parallel>, #tpu.dimension_semantics<parallel>, #tpu.dimension_semantics<parallel>], iteration_bounds = array<i64: 2, 1, 1, 1>, scalar_prefetch = 0 : i64, scratch_operands = 0 : i64, tpu.core_type = #tpu.core_type<tc>, window_params = [{transform_indices = @transform_0, window_bounds = array<i64: 1, 4, 16, 16>}, {transform_indices = @transform_1, window_bounds = array<i64: 1, 16, 4, 16>}]} {
    %c0 = arith.constant 0 : index
    %c0_0 = arith.constant 0 : index
    %c0_1 = arith.constant 0 : index
    %c0_2 = arith.constant 0 : index
    %0 = vector.load %arg4[%c0, %c0_0, %c0_1, %c0_2] : memref<1x4x16x16xf32, #tpu.memory_space<vmem>>, vector<1x4x16x16xf32>
    %1 = tpu.transpose %0, [0, 2, 1, 3] : vector<1x4x16x16xf32> -> vector<1x16x4x16xf32>
    %c0_3 = arith.constant 0 : index
    %c0_4 = arith.constant 0 : index
    %c0_5 = arith.constant 0 : index
    %c0_6 = arith.constant 0 : index
    %2 = vector.load %arg5[%c0_3, %c0_4, %c0_5, %c0_6] : memref<1x16x4x16xf32, #tpu.memory_space<vmem>>, vector<1x16x4x16xf32>
    tpu.vector_store %arg5[%c0_3, %c0_4, %c0_5, %c0_6], %1 {strides = array<i32>} : memref<1x16x4x16xf32, #tpu.memory_space<vmem>>, vector<1x16x4x16xf32>,
    return
  }
  func.func @transform_0(%arg0: i32, %arg1: i32, %arg2: i32, %arg3: i32) -> (i32, i32, i32, i32) {
    %c0_i32 = arith.constant 0 : i32
    return %arg0, %arg1, %arg2, %arg3 : i32, i32, i32, i32
  }
  func.func @transform_1(%arg0: i32, %arg1: i32, %arg2: i32, %arg3: i32) -> (i32, i32, i32, i32) {
    %c0_i32 = arith.constant 0 : i32
    return %arg0, %arg2, %arg1, %arg3 : i32, i32, i32, i32
  }
}

</mosaic_0001>

<bundles_post_ra>
// kernel: tpu_custom_call.1
= control target key start
LH: loop header
LB: loop body
LE: loop exit
PB: predicated region body
PF: predicated region fallthrough
CT: control target
= control target key end

     0   :  { %6 = vsyncpa [#allocation3], 0  ;;  %s840_s0 = inlined_call_operand.hbm [shape: f32[2,4,16,16], index: 0, kind: input, shape index: {}]   ;;  %s841_s1 = inlined_call_operand.hbm [shape: f32[2,16,4,16], index: 1, kind: output, shape index: {}]  }
   0x1   :  { %8 = vsyncpa [#allocation3 + $0x1], 0 }
   0x2   :  { %9 = vsyncpa [#allocation4], 0 }
   0x3   :  { %11 = vsyncpa [#allocation4 + $0x1], 0  ;;  %s674_s6 = smov 0   ;;  %s676_s7 = smov 0  }
   0x4   :  { %s678_s8 = smov 0   ;;  %s680_s9 = smov 0  }
   0x5   :  { %s682_s10 = smov 0   ;;  %s684_s11 = smov 0  }
   0x6 LB: > { %s459_s12 = sadd.s32 4294967295, %s653_s11   ;;  %s460_s13 = sadd.s32 4294967294, %s653_s11   ;;  %s653_s11 = sphi %s684_s11, %s17_s11   ;;  %s649_s10 = sphi %s682_s10, %s852_s10   ;;  %s645_s9 = sphi %s680_s9, %s851_s9   ;;  %s641_s8 = sphi %s678_s8, %s850_s8   ;;  %s637_s7 = sphi %s676_s7, %s849_s7   ;;  %s633_s6 = sphi %s674_s6, %s848_s6  }
   0x7   : > { %s43_s14 = sadd.s32 1, %s649_s10  ;;  %s56_s15 = sadd.s32 1, %s641_s8 }
   0x8   : > { %p45_p0 = scmp.ge.s32.totalorder %s43_s14, 2  ;;  %p63_p1 = scmp.ne.s32.totalorder %s641_s8, %s637_s7 }
   0x9   : > { %p64_p2 = scmp.eq.s32.totalorder %s653_s11, 0  ;;  %p69_p3 = scmp.ne.s32.totalorder %s637_s7, %s633_s6 }
   0xa   : > { %s854_s14 = smov (%p45_p0, %s43_s14), 0  ;;  %p70_p5 = scmp.eq.s32.totalorder %s459_s12, 0 }
   0xb   : > { %p715_p4 = por %p64_p2, %p63_p1  ;;  %s47_s17 = ssub.s32 %s649_s10, %s854_s14 }
   0xc   : > { %p99_p6 = scmp.eq.s32.totalorder %s459_s12, 1  ;;  %p54_p7 = scmp.eq.s32.totalorder %s47_s17, 0 }
   0xd   : > { %p721_p8 = por %p70_p5, %p69_p3  ;;  %p105_p10 = scmp.eq.s32.totalorder %s460_s13, 1 }
   0xe   : > { %p725_p9 = por %p99_p6, %p63_p1  ;;  %p488_p13 = scmp.lt.s32.totalorder %s653_s11, 2 }
   0xf   : > { %s730_s20 = scalar_select %p54_p7, %s641_s8, %s56_s15  }
  0x10   : > { %p732_p11 = por %p105_p10, %p69_p3  ;;  %s125_s22 = sand.u32 1, %s641_s8  }
  0x11   : > { %s463_s23 = sshll.u32 %s125_s22, 6  ;;  %s474_s24 = sshll.u32 %s649_s10, 10 }
  0x12   : > { %s141_s27 = scalar_lea.hbm %s840_s0, %s474_s24  ;;  %s129_s28 = scalar_lea.vmem [#allocation2], %s463_s23 }
  0x13   : > { %s142_s29 = sshll.u32 %s129_s28, 4  ;;  %p745_p0 = pnand %p488_p13, %p715_p4  ;;  %s143_s29 = int_to_ptr.vmem [resolvable:$true] %s142_s29 }
  0x14   : > { %p466_p1 = scmp.ge.s32.totalorder %s653_s11, 1  ;;  %s126_s2 = scalar_lea.sflag [#allocation3], %s125_s22 }
  0x15   : > { %p547_p2 = pneg %p745_p0  ;;  %s558_s3 = scalar_lea.vmem %s143_s29, 1024 }
  0x16   : > { %p559_p3 = scmp.ne.s32.totalorder %s143_s29, %s558_s3  ;;  %s655_s4 = smov [#allocation2]  }
  0x17   : > { %s563_s5 = sshll.u32 %s655_s4, 4  ;;  %s564_s5 = int_to_ptr.vmem [resolvable:$false] %s563_s5 }
  0x18   : > { %p561_p5 = pnand %p559_p3, %p547_p2  ;;  %s565_s12 = scalar_lea.vmem %s564_s5, 2048 }
  0x19   : > { %p566_p7 = scmp.lt.s32.totalorder %s143_s29, %s564_s5  ;;  %p567_p10 = scmp.lt.s32.totalorder %s565_s12, %s558_s3 }
  0x1a   : > { %p562_p6 = pneg %p561_p5 }
  0x1b   : > { %p568_p12 = por %p567_p10, %p566_p7 }
  0x1d   : > { %p569_p4 = pnand %p568_p12, %p562_p6 }
  0x1f   : > { %572 = shalt.err (!%p569_p4)
}
  0x20   : > { %s656_s13 = smov 128   ;;  %s657_s15 = smov 8  }
  0x21   : > { %483 = dma.hbm_to_vmem [thread:$0]  (!%p745_p0), %s141_s27, 1024, %s143_s29, %s126_s2, %s656_s13, %s656_s13, %s657_s15  }
  0x22   : > { %p150_p13 = scmp.lt.s32.totalorder %s653_s11, 3 }
  0x24   : > { %p151_p2 = pnand %p466_p1, %p150_p13 }
  0x25   : > { %s758_s16 = sand.u32 (!%p151_p2), 1, %s637_s7  }
  0x26   : > { %154 = sbr.rel (%p151_p2) target bundleno = 78 (0x4e), region = 24  ;;  %s467_s17 = sshll.u32 (!%p151_p2), %s758_s16, 6 }
  0x27   : > { %s157_s22 = scalar_lea.sflag (!%p151_p2), [#allocation3], %s758_s16  ;;  %s160_s23 = scalar_lea.vmem (!%p151_p2), [#allocation2], %s467_s17 }
  0x2b   : > { %624 = dma.done.wait (%p721_p8), %s157_s22, 1024  }
  0x2c   : > { %626 = vsyncadd (%p721_p8), %s157_s22, 4294966272  ;;  %v195_v0 = vlaneseq  ;;  %v658_v1 = vmov 1983009808   ;;  %v659_v3 = vmov 1934713408   ;;  %v182_v9 = vld [vmem:[%s160_s23] sm:$0xff] }
  0x2d   : > { %v193_v2 = vunpack.c.l.s4 %v658_v1  ;;  %v225_v4 = vunpack.c.l.s4 %v659_v3  ;;  %v184_v10 = vld [vmem:[%s160_s23 + $0x10] sm:$0xff]  ;;  %v186_v11 = vld [vmem:[%s160_s23 + $0x20] sm:$0xff]  ;;  %v183_v15 = vld [vmem:[%s160_s23 + $0x8] sm:$0xff]  ;;  %vm326_vm0 = vcmask 125952   ;;  %s475_s18 = sshll.u32 %s645_s9, 10  ;;  %s178_s24 = scalar_lea.vmem [#allocation5], %s467_s17 }
  0x2e   : > { %v196_v5 = vshrl.u32 %v195_v0, 7  ;;  %v188_v12 = vld [vmem:[%s160_s23 + $0x30] sm:$0xff]  ;;  %v190_v13 = vcombine.low %v182_v9, %v186_v11  ;;  %v191_v14 = vcombine.high %v182_v9, %v186_v11  ;;  %v185_v16 = vld [vmem:[%s160_s23 + $0x18] sm:$0xff]  ;;  %v187_v20 = vld [vmem:[%s160_s23 + $0x28] sm:$0xff]  ;;  %s361_s25 = sshll.u32 %s178_s24, 4  ;;  %v660_v48 = vmov 0.0   ;;  %s784_s27 = scalar_lea.hbm %s841_s1, %s475_s18  ;;  %s786_s25 = int_to_ptr.vmem [resolvable:$true] %s361_s25 }
  0x2f   : > { %v194_v6 = vunpack.c.0.s8 %v193_v2  ;;  %v226_v7 = vunpack.c.0.s8 %v225_v4  ;;  %v206_v17 = vcombine.low %v184_v10, %v188_v12  ;;  %v207_v19 = vcombine.high %v184_v10, %v188_v12  ;;  %v189_v21 = vld [vmem:[%s160_s23 + $0x38] sm:$0xff]  ;;  %s344_s28 = scalar_lea.sflag [#allocation4], %s758_s16  ;;  %s573_s29 = scalar_lea.vmem %s786_s25, 1024 }
  0x30   : > { %v258_v24 = vcombine.low %v183_v15, %v187_v20  ;;  %v274_v25 = vcombine.low %v185_v16, %v189_v21  ;;  %v259_v28 = vcombine.high %v183_v15, %v187_v20  ;;  %v275_v29 = vcombine.high %v185_v16, %v189_v21  ;;  %p574_p8 = scmp.ne.s32.totalorder %s786_s25, %s573_s29  ;;  %s661_s30 = smov [#allocation5]  }
  0x31   : > { %v197_v8 = vsub.s32 %v194_v6, %v196_v5  ;;  %v229_v18 = vsub.s32 %v226_v7, %v196_v5  ;;  %s577_s2 = sshll.u32 %s661_s30, 4  ;;  %s578_s2 = int_to_ptr.vmem [resolvable:$false] %s577_s2 }
  0x32   : > { %p575_p12 = pnand %p574_p8, %p725_p9  ;;  %s579_s3 = scalar_lea.vmem %s578_s2, 2048 }
  0x33   : > { %v198_v22 = vrot.slane %v190_v13, %v197_v8  ;;  %v205_v23 = vrot.slane %v191_v14, %v197_v8  ;;  %v214_v26 = vrot.slane %v206_v17, %v197_v8  ;;  %v221_v27 = vrot.slane %v207_v19, %v197_v8  ;;  %p580_p1 = scmp.lt.s32.totalorder %s786_s25, %s578_s2  ;;  %p581_p3 = scmp.lt.s32.totalorder %s579_s3, %s573_s29 }
  0x34   : > { %v266_v30 = vrot.slane %v258_v24, %v197_v8  ;;  %v282_v31 = vrot.slane %v274_v25, %v197_v8  ;;  %v273_v38 = vrot.slane %v259_v28, %v197_v8  ;;  %v289_v39 = vrot.slane %v275_v29, %v197_v8  ;;  %p576_p0 = pneg %p575_p12 }
  0x35   : > { %v222_v32 = vcombine.low %v198_v22, %v214_v26  ;;  %v223_v33 = vcombine.high %v198_v22, %v214_v26  ;;  %v238_v34 = vcombine.low %v205_v23, %v221_v27  ;;  %v239_v35 = vcombine.high %v205_v23, %v221_v27  ;;  %p582_p5 = por %p581_p3, %p580_p1 }
  0x36   : > { %v290_v36 = vcombine.low %v266_v30, %v282_v31  ;;  %v291_v37 = vcombine.high %v266_v30, %v282_v31  ;;  %v306_v46 = vcombine.low %v273_v38, %v289_v39  ;;  %v307_v47 = vcombine.high %v273_v38, %v289_v39 }
  0x37   : > { %v230_v40 = vrot.slane %v222_v32, %v229_v18  ;;  %v237_v41 = vrot.slane %v223_v33, %v229_v18  ;;  %v246_v42 = vrot.slane %v238_v34, %v229_v18  ;;  %v253_v43 = vrot.slane %v239_v35, %v229_v18  ;;  %p583_p6 = pnand %p582_p5, %p576_p0 }
  0x38   : > { %v298_v44 = vrot.slane %v290_v36, %v229_v18  ;;  %v305_v45 = vrot.slane %v291_v37, %v229_v18  ;;  %v314_v55 = vrot.slane %v306_v46, %v229_v18  ;;  %v321_v56 = vrot.slane %v307_v47, %v229_v18 }
  0x39   : > { %327 = vst.msk [vmem:[%s178_s24] sm:$0xf] %vm326_vm0, %v230_v40  ;;  %v254_v49 = vcombine.high %v230_v40, %v660_v48  ;;  %329 = vst.msk [vmem:[%s178_s24 + $0x8] sm:$0xf] %vm326_vm0, %v237_v41  ;;  %v255_v50 = vcombine.high %v237_v41, %v660_v48  ;;  %v256_v51 = vcombine.high %v246_v42, %v660_v48 }
  0x3a   : > { %331 = vst.msk [vmem:[%s178_s24 + $0x10] sm:$0xf] %vm326_vm0, %v246_v42  ;;  %333 = vst.msk [vmem:[%s178_s24 + $0x18] sm:$0xf] %vm326_vm0, %v253_v43  ;;  %v257_v52 = vcombine.high %v253_v43, %v660_v48  ;;  %v322_v53 = vcombine.high %v298_v44, %v660_v48  ;;  %v323_v54 = vcombine.high %v305_v45, %v660_v48 }
  0x3b   : > { %335 = vst.msk [vmem:[%s178_s24 + $0x20] sm:$0xf] %vm326_vm0, %v298_v44  ;;  %337 = vst.msk [vmem:[%s178_s24 + $0x28] sm:$0xf] %vm326_vm0, %v305_v45  ;;  %v324_v57 = vcombine.high %v314_v55, %v660_v48  ;;  %v325_v58 = vcombine.high %v321_v56, %v660_v48 }
  0x3c   : > { %328 = vst.msk [vmem:[%s178_s24 + $0x4] sm:$0xf] %vm326_vm0, %v254_v49  ;;  %330 = vst.msk [vmem:[%s178_s24 + $0xc] sm:$0xf] %vm326_vm0, %v255_v50 }
  0x3d   : > { %332 = vst.msk [vmem:[%s178_s24 + $0x14] sm:$0xf] %vm326_vm0, %v256_v51  ;;  %334 = vst.msk [vmem:[%s178_s24 + $0x1c] sm:$0xf] %vm326_vm0, %v257_v52 }
  0x3e   : > { %336 = vst.msk [vmem:[%s178_s24 + $0x24] sm:$0xf] %vm326_vm0, %v322_v53  ;;  %338 = vst.msk [vmem:[%s178_s24 + $0x2c] sm:$0xf] %vm326_vm0, %v323_v54 }
  0x3f   : > { %339 = vst.msk [vmem:[%s178_s24 + $0x30] sm:$0xf] %vm326_vm0, %v314_v55  ;;  %341 = vst.msk [vmem:[%s178_s24 + $0x38] sm:$0xf] %vm326_vm0, %v321_v56 }
  0x40   : > { %340 = vst.msk [vmem:[%s178_s24 + $0x34] sm:$0xf] %vm326_vm0, %v324_v57  ;;  %342 = vst.msk [vmem:[%s178_s24 + $0x3c] sm:$0xf] %vm326_vm0, %v325_v58 }
  0x41   : > { %586 = shalt.err (!%p583_p6)
}
  0x42   : > { %s587_s4 = scalar_lea.hbm %s784_s27, 1024  ;;  %s591_s13 = scalar_lea.hbm %s841_s1, 2048 }
  0x43   : > { %p588_p7 = scmp.ne.s32.totalorder %s784_s27, %s587_s4  ;;  %p592_p13 = scmp.lt.s32.totalorder %s784_s27, %s841_s1 }
  0x44   : > { %p593_p2 = scmp.lt.s32.totalorder %s591_s13, %s587_s4 }
  0x45   : > { %p589_p10 = pnand %p588_p7, %p725_p9 }
  0x46   : > { %p594_p8 = por %p593_p2, %p592_p13 }
  0x47   : > { %p590_p4 = pneg %p589_p10 }
  0x49   : > { %p595_p12 = pnand %p594_p8, %p590_p4 }
  0x4b   : > { %598 = shalt.err (!%p595_p12)
}
  0x4c   : > { %s662_s22 = smov 64   ;;  %s663_s23 = smov 4  }
  0x4d   : > { %478 = dma.vmem_to_hbm [thread:$0]  (%p725_p9), %s786_s25, 1024, %s784_s27, %s344_s28, %s662_s22, %s662_s22, %s663_s23  }
  0x4e PF: > { %s376_s18 = sand.u32 1, %s633_s6   ;;  %p847_p0 = scmp.ge.s32.totalorder %s653_s11, 2 }
  0x4f   : > { %s377_s24 = scalar_lea.sflag [#allocation4], %s376_s18 }
  0x50   : > { %p485_p1 = pnand %p847_p0, %p732_p11 }
  0x52   : > { %p486_p3 = pneg %p485_p1 }
  0x54   : > { %628 = dma.done.wait (%p486_p3), %s377_s24, 1024  }
  0x55   : > { %630 = vsyncadd (%p486_p3), %s377_s24, 4294966272  ;;  %s17_s11 = sadd.s32 1, %s653_s11   ;;  %s848_s6 = smov %s637_s7 }
  0x56   : > { %p14_p5 = scmp.ge.s32.totalorder %s17_s11, 4   ;;  %s849_s7 = smov %s641_s8 }
  0x57   : > { %s850_s8 = smov %s730_s20  ;;  %s851_s9 = smov %s649_s10 }
  0x58   : > { %s852_s10 = smov %s854_s14  ;;  %16 = sbr.rel (!%p14_p5) target bundleno = 6 (0x6), region = 69 }
  0x5d   :  { %382 = vsyncpa [#allocation3], 1 }
  0x5e   :  { %384 = vsyncpa [#allocation3 + $0x1], 1 }
  0x5f   :  { %385 = vsyncpa [#allocation4], 1 }
  0x60   :  { %387 = vsyncpa [#allocation4 + $0x1], 1 }

</bundles_post_ra>
